<compile_context>
chip_gen: v6e
topology: v6e:2x2x1
jax: 0.10.0
libtpu: 0.0.40
codegen_flags: <defaults>
</compile_context>

<pallas_src>
import functools

import jax
import jax.numpy as jnp
from jax.experimental import pallas as pl
from jax.experimental.pallas import tpu as pltpu


def _patch_merging_kernel(xe_ref, xo_ref, we_ref, wo_ref, bias_ref, o_ref):
    # xe_ref:  (TG, W2, 2C)   even image rows -> channel halves [x0 | x2]
    # xo_ref:  (TG, W2, 2C)   odd  image rows -> channel halves [x1 | x3]
    # we_ref:  (2C, 2Cout)    gamma-scaled reduction rows, even half (bf16)
    # wo_ref:  (2C, 2Cout)    gamma-scaled reduction rows, odd half  (bf16)
    # bias_ref:(1, 2Cout)     beta @ W^T (f32)
    # o_ref:   (TG, W2, 2Cout)
    tg, w2, c2 = xe_ref.shape
    mt = tg * w2
    inv_4c = 1.0 / (2.0 * c2)

    xe = xe_ref[...].reshape(mt, c2).astype(jnp.float32)   # [x0 | x2]
    xo = xo_ref[...].reshape(mt, c2).astype(jnp.float32)   # [x1 | x3]

    # LayerNorm stats over the virtual 4C axis: 2 cross-lane reductions (XLU)
    # instead of 4; one-pass biased variance (torch semantics), eps inside sqrt.
    s1 = jnp.sum(xe + xo, axis=-1, keepdims=True)
    s2 = jnp.sum(xe * xe + xo * xo, axis=-1, keepdims=True)
    mean = s1 * inv_4c
    var = s2 * inv_4c - mean * mean
    r = jax.lax.rsqrt(var + 1e-5)

    # gamma/beta are folded into we/wo/bias outside -> only (x - mean) * r here.
    ne = ((xe - mean) * r).astype(we_ref.dtype)
    no = ((xo - mean) * r).astype(wo_ref.dtype)

    # Linear(4C -> 2Cout, no bias) as two 2C-contraction matmuls (bf16 MXU,
    # f32 accumulation) written as one accumulation expression, plus the
    # folded LayerNorm-bias contribution.
    acc = (jnp.dot(ne, we_ref[...], preferred_element_type=jnp.float32)
           + jnp.dot(no, wo_ref[...], preferred_element_type=jnp.float32)
           + bias_ref[...])
    o_ref[...] = acc.reshape(tg, w2, -1).astype(o_ref.dtype)


@functools.partial(jax.jit, static_argnames=("H", "W"))
def patch_merging(x, gamma, beta, weight, *, H, W):
    """x: (B, H*W, C); weight: torch nn.Linear weight (2C, 4C) -> (B, H/2*W/2, 2C)."""
    B, L, C = x.shape
    assert L == H * W, "input feature has wrong size"
    assert H % 2 == 0 and W % 2 == 0, f"x size ({H}*{W}) are not even."
    H2, W2 = H // 2, W // 2
    BH2 = B * H2
    C2 = 2 * C            # per-half lane width (even / odd image row)
    C4 = 4 * C
    Cout = 2 * C

    # --- parameter prep (params only, never activations) -------------------
    # Kernel channel order over the virtual 4C axis is [x0, x2, x1, x3];
    # torch order is [x0, x1, x2, x3].  LN stats are permutation invariant.
    perm = jnp.concatenate([
        jnp.arange(0, C), jnp.arange(2 * C, 3 * C),
        jnp.arange(C, 2 * C), jnp.arange(3 * C, 4 * C)])
    w_k = weight.T.astype(jnp.float32)[perm, :]            # (4C, Cout), kernel order
    gamma_k = gamma.astype(jnp.float32)[perm]
    w_scaled = (gamma_k[:, None] * w_k).astype(jnp.bfloat16)
    we, wo = w_scaled[:C2], w_scaled[C2:]
    bias = jnp.dot(beta.astype(jnp.float32),
                   weight.T.astype(jnp.float32)).reshape(1, Cout)

    # --- activation view: free row-major reinterpretation ------------------
    # (B, H*W, C) -> (B*H2, 2, W2, 2C); dim1 = image-row parity; last dim packs
    # the column pair -> channel halves [x0|x2] (even row) / [x1|x3] (odd row).
    x4 = x.reshape(BH2, 2, W2, C2)

    # --- generation-aware tile sizing ---------------------------------------
    try:
        cap = int(pltpu.get_tpu_info().vmem_capacity_bytes)
    except Exception:
        cap = 64 * 1024 * 1024           # conservative: v7x per-TensorCore VMEM
    vmem_limit = min((cap * 3) // 4, 96 * 1024 * 1024)
    budget = vmem_limit // 2             # pipelined blocks + temporaries + params

    xb = x.dtype.itemsize
    ob = x.dtype.itemsize
    # Per row-pair-group: double-buffered in/out blocks + in-kernel temporaries
    # (f32 xe/xo + normalize products + bf16 casts + f32 accumulators).
    per_tg = (2 * 2 * W2 * C2 * xb             # xe/xo blocks, double-buffered
              + 2 * W2 * Cout * ob             # output block, double-buffered
              + 20 * W2 * C2 + 8 * W2 * Cout)  # temporaries high-water estimate
    fixed = 2 * 2 * C2 * Cout * 2 + 2 * Cout * 4   # bf16 weights (x2 bufs) + bias
    tg_fit = max(1, (budget - fixed) // per_tg)
    tg = int(max(1, min(tg_fit, BH2, max(1, BH2 // 8))))   # keep >= 8 grid steps
    grid = (pl.cdiv(BH2, tg),)

    M = BH2 * W2
    cost = pl.CostEstimate(
        flops=2 * M * C4 * Cout + 8 * M * C4,
        transcendentals=M,
        bytes_accessed=M * C4 * xb + M * Cout * ob + C4 * Cout * 2 + Cout * 4,
    )

    out = pl.pallas_call(
        _patch_merging_kernel,
        out_shape=jax.ShapeDtypeStruct((BH2, W2, Cout), x.dtype),
        grid=grid,
        in_specs=[
            pl.BlockSpec((tg, None, W2, C2), lambda i: (i, 0, 0, 0)),  # even rows
            pl.BlockSpec((tg, None, W2, C2), lambda i: (i, 1, 0, 0)),  # odd rows
            pl.BlockSpec((C2, Cout), lambda i: (0, 0)),                # W even half
            pl.BlockSpec((C2, Cout), lambda i: (0, 0)),                # W odd half
            pl.BlockSpec((1, Cout), lambda i: (0, 0)),                 # folded bias
        ],
        out_specs=pl.BlockSpec((tg, W2, Cout), lambda i: (i, 0, 0)),
        compiler_params=pltpu.CompilerParams(
            dimension_semantics=("parallel",),       # v7x: 2 TCs split the grid
            vmem_limit_bytes=vmem_limit,
        ),
        cost_estimate=cost,
    )(x4, x4, we, wo, bias)

    return out.reshape(B, H2 * W2, Cout)


def _reference(x, gamma, beta, weight, H, W):
    """Torch-faithful f32 reference (same math as the PyTorch module)."""
    B, L, C = x.shape
    xr = x.reshape(B, H, W, C)
    x0 = xr[:, 0::2, 0::2, :]
    x1 = xr[:, 1::2, 0::2, :]
    x2 = xr[:, 0::2, 1::2, :]
    x3 = xr[:, 1::2, 1::2, :]
    xm = jnp.concatenate([x0, x1, x2, x3], -1).reshape(B, -1, 4 * C)
    mean = jnp.mean(xm, -1, keepdims=True)
    var = jnp.mean((xm - mean) ** 2, -1, keepdims=True)
    y = (xm - mean) / jnp.sqrt(var + 1e-5) * gamma + beta
    return y @ weight.T


if __name__ == "__main__":
    # Small shapes consistent with the module: B=2, H=W=8, dim C=32.
    B, H, W, C = 2, 8, 8, 32
    key = jax.random.PRNGKey(0)
    kx, kw, kg, kb = jax.random.split(key, 4)

    x = jax.random.normal(kx, (B, H * W, C), dtype=jnp.float32)

    # Deterministic synthetic parameters (not a checkpoint load).
    # nn.Linear(4C, 2C, bias=False): torch weight layout is (2C, 4C).
    weight = jax.random.normal(kw, (2 * C, 4 * C), dtype=jnp.float32) * 0.02
    # nn.LayerNorm(4C): default weight=1, bias=0; perturb slightly for rigor.
    gamma = 1.0 + 0.01 * jax.random.normal(kg, (4 * C,), dtype=jnp.float32)
    beta = 0.01 * jax.random.normal(kb, (4 * C,), dtype=jnp.float32)

    out = patch_merging(x, gamma, beta, weight, H=H, W=W)
    out = jax.block_until_ready(out)

    ref = _reference(x, gamma, beta, weight, H, W)
    assert out.shape == (B, (H // 2) * (W // 2), 2 * C), out.shape
    # bf16 MXU inputs (intentional, per perf review) vs f32 reference.
    max_err = float(jnp.max(jnp.abs(out - ref)))
    assert max_err < 2e-2, max_err

    print("KERNEL_OK")
</pallas_src>

<mosaic_0001>
module attributes {stable_mosaic.version = 11 : i64} {
  func.func @_patch_merging_kernel(%arg0: i32, %arg1: memref<1x1x4x64xf32, #tpu.memory_space<vmem>>, %arg2: memref<1x1x4x64xf32, #tpu.memory_space<vmem>>, %arg3: memref<64x64xbf16, #tpu.memory_space<vmem>>, %arg4: memref<64x64xbf16, #tpu.memory_space<vmem>>, %arg5: memref<1x64xf32, #tpu.memory_space<vmem>>, %arg6: memref<1x4x64xf32, #tpu.memory_space<vmem>>) attributes {dimension_semantics = [#tpu.dimension_semantics<parallel>], iteration_bounds = array<i64: 8>, scalar_prefetch = 0 : i64, scratch_operands = 0 : i64, tpu.core_type = #tpu.core_type<tc>, window_params = [{transform_indices = @transform_0, window_bounds = array<i64: 1, 1, 4, 64>}, {transform_indices = @transform_1, window_bounds = array<i64: 1, 1, 4, 64>}, {pipeline_mode = #tpu.pipeline_mode<synchronous>, transform_indices = @transform_2, window_bounds = array<i64: 64, 64>}, {pipeline_mode = #tpu.pipeline_mode<synchronous>, transform_indices = @transform_3, window_bounds = array<i64: 64, 64>}, {pipeline_mode = #tpu.pipeline_mode<synchronous>, transform_indices = @transform_4, window_bounds = array<i64: 1, 64>}, {transform_indices = @transform_5, window_bounds = array<i64: 1, 4, 64>}]} {
    %c0 = arith.constant 0 : index
    %c0_0 = arith.constant 0 : index
    %c0_1 = arith.constant 0 : index
    %c0_2 = arith.constant 0 : index
    %0 = vector.load %arg1[%c0, %c0_0, %c0_1, %c0_2] : memref<1x1x4x64xf32, #tpu.memory_space<vmem>>, vector<1x1x4x64xf32>
    %1 = vector.shape_cast %0 : vector<1x1x4x64xf32> to vector<1x4x64xf32>
    %2 = vector.shape_cast %1 : vector<1x4x64xf32> to vector<4x64xf32>
    %c0_3 = arith.constant 0 : index
    %c0_4 = arith.constant 0 : index
    %c0_5 = arith.constant 0 : index
    %c0_6 = arith.constant 0 : index
    %3 = vector.load %arg2[%c0_3, %c0_4, %c0_5, %c0_6] : memref<1x1x4x64xf32, #tpu.memory_space<vmem>>, vector<1x1x4x64xf32>
    %4 = vector.shape_cast %3 : vector<1x1x4x64xf32> to vector<1x4x64xf32>
    %5 = vector.shape_cast %4 : vector<1x4x64xf32> to vector<4x64xf32>
    %6 = arith.addf %2, %5 : vector<4x64xf32>
    %cst = arith.constant dense<0.000000e+00> : vector<4xf32>
    %7 = vector.multi_reduction <add>, %6, %cst [1] : vector<4x64xf32> to vector<4xf32>
    %8 = vector.shape_cast %7 : vector<4xf32> to vector<4x1xf32>
    %9 = arith.mulf %2, %2 : vector<4x64xf32>
    %10 = arith.mulf %5, %5 : vector<4x64xf32>
    %11 = arith.addf %9, %10 : vector<4x64xf32>
    %cst_7 = arith.constant dense<0.000000e+00> : vector<4xf32>
    %12 = vector.multi_reduction <add>, %11, %cst_7 [1] : vector<4x64xf32> to vector<4xf32>
    %13 = vector.shape_cast %12 : vector<4xf32> to vector<4x1xf32>
    %cst_8 = arith.constant 7.812500e-03 : f32
    %14 = vector.broadcast %cst_8 : f32 to vector<4x1xf32>
    %15 = arith.mulf %8, %14 : vector<4x1xf32>
    %cst_9 = arith.constant 7.812500e-03 : f32
    %16 = vector.broadcast %cst_9 : f32 to vector<4x1xf32>
    %17 = arith.mulf %13, %16 : vector<4x1xf32>
    %18 = arith.mulf %15, %15 : vector<4x1xf32>
    %19 = arith.subf %17, %18 : vector<4x1xf32>
    %cst_10 = arith.constant 9.99999974E-6 : f32
    %20 = vector.broadcast %cst_10 : f32 to vector<4x1xf32>
    %21 = arith.addf %19, %20 : vector<4x1xf32>
    %22 = math.rsqrt %21 : vector<4x1xf32>
    %23 = vector.broadcast %15 : vector<4x1xf32> to vector<4x64xf32>
    %24 = arith.subf %2, %23 : vector<4x64xf32>
    %25 = vector.broadcast %22 : vector<4x1xf32> to vector<4x64xf32>
    %26 = arith.mulf %24, %25 : vector<4x64xf32>
    %27 = arith.truncf %26 : vector<4x64xf32> to vector<4x64xbf16>
    %28 = vector.broadcast %15 : vector<4x1xf32> to vector<4x64xf32>
    %29 = arith.subf %5, %28 : vector<4x64xf32>
    %30 = vector.broadcast %22 : vector<4x1xf32> to vector<4x64xf32>
    %31 = arith.mulf %29, %30 : vector<4x64xf32>
    %32 = arith.truncf %31 : vector<4x64xf32> to vector<4x64xbf16>
    %c0_11 = arith.constant 0 : index
    %c0_12 = arith.constant 0 : index
    %33 = vector.load %arg3[%c0_11, %c0_12] : memref<64x64xbf16, #tpu.memory_space<vmem>>, vector<64x64xbf16>
    %cst_13 = arith.constant dense<0.000000e+00> : vector<4x64xf32>
    %34 = tpu.matmul %27, %33, %cst_13 {dimension_numbers = #tpu.dot_dimension_numbers<[1], [0], [0], [1], [0, 0, 1, 1], [], []>} : vector<4x64xbf16>, vector<64x64xbf16>, vector<4x64xf32> -> vector<4x64xf32>
    %c0_14 = arith.constant 0 : index
    %c0_15 = arith.constant 0 : index
    %35 = vector.load %arg4[%c0_14, %c0_15] : memref<64x64xbf16, #tpu.memory_space<vmem>>, vector<64x64xbf16>
    %cst_16 = arith.constant dense<0.000000e+00> : vector<4x64xf32>
    %36 = tpu.matmul %32, %35, %cst_16 {dimension_numbers = #tpu.dot_dimension_numbers<[1], [0], [0], [1], [0, 0, 1, 1], [], []>} : vector<4x64xbf16>, vector<64x64xbf16>, vector<4x64xf32> -> vector<4x64xf32>
    %37 = arith.addf %34, %36 : vector<4x64xf32>
    %c0_17 = arith.constant 0 : index
    %c0_18 = arith.constant 0 : index
    %38 = vector.load %arg5[%c0_17, %c0_18] : memref<1x64xf32, #tpu.memory_space<vmem>>, vector<1x64xf32>
    %39 = vector.broadcast %38 : vector<1x64xf32> to vector<4x64xf32>
    %40 = arith.addf %37, %39 : vector<4x64xf32>
    %41 = vector.shape_cast %40 : vector<4x64xf32> to vector<1x4x64xf32>
    %c0_19 = arith.constant 0 : index
    %c0_20 = arith.constant 0 : index
    %c0_21 = arith.constant 0 : index
    %42 = vector.load %arg6[%c0_19, %c0_20, %c0_21] : memref<1x4x64xf32, #tpu.memory_space<vmem>>, vector<1x4x64xf32>
    tpu.vector_store %arg6[%c0_19, %c0_20, %c0_21], %41 {strides = array<i32>} : memref<1x4x64xf32, #tpu.memory_space<vmem>>, vector<1x4x64xf32>,
    return
  }
  func.func @transform_0(%arg0: i32) -> (i32, i32, i32, i32) {
    %c0_i32 = arith.constant 0 : i32
    %c0_i32_0 = arith.constant 0 : i32
    %c0_i32_1 = arith.constant 0 : i32
    %c0_i32_2 = arith.constant 0 : i32
    return %arg0, %c0_i32, %c0_i32_0, %c0_i32_1 : i32, i32, i32, i32
  }
  func.func @transform_1(%arg0: i32) -> (i32, i32, i32, i32) {
    %c1_i32 = arith.constant 1 : i32
    %c0_i32 = arith.constant 0 : i32
    %c0_i32_0 = arith.constant 0 : i32
    %c0_i32_1 = arith.constant 0 : i32
    return %arg0, %c1_i32, %c0_i32, %c0_i32_0 : i32, i32, i32, i32
  }
  func.func @transform_2(%arg0: i32) -> (i32, i32) {
    %c0_i32 = arith.constant 0 : i32
    %c0_i32_0 = arith.constant 0 : i32
    %c0_i32_1 = arith.constant 0 : i32
    return %c0_i32, %c0_i32_0 : i32, i32
  }
  func.func @transform_3(%arg0: i32) -> (i32, i32) {
    %c0_i32 = arith.constant 0 : i32
    %c0_i32_0 = arith.constant 0 : i32
    %c0_i32_1 = arith.constant 0 : i32
    return %c0_i32, %c0_i32_0 : i32, i32
  }
  func.func @transform_4(%arg0: i32) -> (i32, i32) {
    %c0_i32 = arith.constant 0 : i32
    %c0_i32_0 = arith.constant 0 : i32
    %c0_i32_1 = arith.constant 0 : i32
    return %c0_i32, %c0_i32_0 : i32, i32
  }
  func.func @transform_5(%arg0: i32) -> (i32, i32, i32) {
    %c0_i32 = arith.constant 0 : i32
    %c0_i32_0 = arith.constant 0 : i32
    %c0_i32_1 = arith.constant 0 : i32
    return %arg0, %c0_i32, %c0_i32_0 : i32, i32, i32
  }
}

</mosaic_0001>

<bundles_post_ra>
// kernel: patch_merging.1
= control target key start
LH: loop header
LB: loop body
LE: loop exit
PB: predicated region body
PF: predicated region fallthrough
CT: control target
= control target key end

     0   :  { %10 = vsyncpa [#allocation3], 0  ;;  %s862_s0 = inlined_call_operand.vmem [shape: f32[8,2,4,64], index: 0, kind: input, shape index: {}, may-alias: {0,1}]   ;;  %s863_s1 = inlined_call_operand.vmem [shape: f32[8,2,4,64], index: 1, kind: input, shape index: {}, may-alias: {0,1}]   ;;  %s864_s2 = inlined_call_operand.vmem [shape: bf16[64,64], index: 2, kind: input, shape index: {}]   ;;  %s865_s3 = inlined_call_operand.vmem [shape: bf16[64,64], index: 3, kind: input, shape index: {}]   ;;  %s866_s4 = inlined_call_operand.vmem [shape: f32[1,64], index: 4, kind: input, shape index: {}]   ;;  %s867_s5 = inlined_call_operand.hbm [shape: f32[8,4,64], index: 5, kind: output, shape index: {}]  }
   0x1   :  { %12 = vsyncpa [#allocation3 + $0x1], 0  ;;  %s730_s18 = smov 0   ;;  %s732_s19 = smov 0  }
   0x2   :  { %s734_s20 = smov 0   ;;  %s736_s21 = smov 0  }
   0x3 LB: > { %s751_s22 = sadd.s32 4294967295, %s695_s21   ;;  %s523_s23 = sadd.s32 4294967294, %s695_s21   ;;  %s695_s21 = sphi %s736_s21, %s873_s21   ;;  %s691_s20 = sphi %s734_s20, %s872_s20   ;;  %s687_s19 = sphi %s732_s19, %s871_s19   ;;  %s683_s18 = sphi %s730_s18, %s870_s18  }
   0x4   : > { %s755_s24 = sadd.s32 1, %s695_s21   ;;  %s140_s25 = sadd.s32 1, %s691_s20 }
   0x5   : > { %s137_s26 = ssub.s32 %s695_s21, %s755_s24  ;;  %p150_p0 = scmp.ne.s32.totalorder %s691_s20, %s687_s19 }
   0x6   : > { %p138_p1 = scmp.eq.s32.totalorder %s137_s26, 0  ;;  %p151_p2 = scmp.eq.s32.totalorder %s751_s22, 7 }
   0x7   : > { %p156_p3 = scmp.ne.s32.totalorder %s687_s19, %s683_s18  ;;  %p157_p4 = scmp.eq.s32.totalorder %s523_s23, 7 }
   0x8   : > { %s766_s27 = scalar_select %p138_p1, %s691_s20, %s140_s25  }
   0x9   : > { %p768_p5 = por %p151_p2, %p150_p0  ;;  %p772_p6 = por %p157_p4, %p156_p3 }
   0xa   : > { %p526_p7 = scmp.ge.s32.totalorder %s695_s21, 1  ;;  %p201_p8 = scmp.lt.s32.totalorder %s695_s21, 9 }
   0xc   : > { %p202_p9 = pnand %p526_p7, %p201_p8 }
   0xd   : > { %p235_p10 = scmp.lt.s32.totalorder (!%p202_p9), %s751_s22, 7  ;;  %s232_s13 = sand.u32 (!%p202_p9), 1, %s687_s19  }
   0xe   : > { %205 = sbr.rel (%p202_p9) target bundleno = 404 (0x194), region = 40  ;;  %s527_s14 = sshll.u32 (!%p202_p9), %s232_s13, 2 }
   0xf   : > { %s545_s17 = sshll.u32 (!%p202_p9), %s751_s22, 6  ;;  %s234_s23 = scalar_lea.vmem (!%p202_p9), [#allocation2], %s527_s14 }
  0x10   : > { %s446_s25 = sshll.u32 (!%p202_p9), %s234_s23, 4  ;;  %s699_s8 = smov (!%p202_p9), [#allocation2]   ;;  %s822_s25 = int_to_ptr.vmem [resolvable:$true] %s446_s25 }
  0x11   : > { %s635_s7 = scalar_lea.vmem (!%p202_p9), %s822_s25, 64 }
  0x12   : > { %p636_p11 = scmp.ne.s32.totalorder (!%p202_p9), %s822_s25, %s635_s7 }
  0x13   : > { %s236_s30 = scalar_select %p235_p10, %s751_s22, 7  ;;  %vm250_vm0 = vcmask 519168   ;;  %v625_v8 = vld [vmem:[%s865_s3 + $0x18] sm:$0xff]   ;;  %v697_v10 = vmov 0.0   ;;  %v627_v11 = vld [vmem:[%s865_s3 + $0x10] sm:$0xff]   ;;  %vm698_vm1 = vmmov 0  }
  0x14   : > { %v626_v9 = vld [vmem:[%s864_s2 + $0x18] sm:$0xff]   ;;  %560 = vmatprep.subr.bf16.mxu0 %v697_v10  ;;  %572 = vmatprep.subr.bf16.mxu1 %v697_v10  ;;  %v628_v12 = vld [vmem:[%s864_s2 + $0x10] sm:$0xff]   ;;  %v629_v13 = vld [vmem:[%s865_s3 + $0x8] sm:$0xff]   ;;  %vm312_vm2 = vcmask 523264   ;;  %s433_s22 = scalar_lea.sflag [#allocation3], %s232_s13  ;;  %p637_p12 = pnand %p636_p11, %p768_p5 }
  0x15   : > { %s548_s6 = sshll.u32 %s236_s30, 3  ;;  %561 = vmatpush3.bf16.msra.mxu0 %v625_v8  ;;  %573 = vmatpush3.bf16.msra.mxu1 %v626_v9  ;;  %v630_v14 = vld [vmem:[%s864_s2 + $0x8] sm:$0xff]   ;;  %v631_v15 = vld [vmem:[%s865_s3] sm:$0xff]  }
  0x16   : > { %s239_s9 = scalar_lea.vmem %s862_s0, %s548_s6  ;;  %s486_s12 = scalar_lea.vmem %s863_s1, %s548_s6  ;;  %562 = vmatprep.subr.bf16.mxu0 %v697_v10  ;;  %574 = vmatprep.subr.bf16.mxu1 %v697_v10  ;;  %v632_v16 = vld [vmem:[%s864_s2] sm:$0xff]  }
  0x17   : > { %v247_v0 = vld [vmem:[%s239_s9] sm:$0xf]  ;;  %v532_v1 = vld [vmem:[%s486_s12 + $0x4] sm:$0xf]  ;;  %568 = vmatprep.mubr.msk.bf16.mxu0 %vm698_vm1, %v697_v10  ;;  %580 = vmatprep.mubr.msk.bf16.mxu1 %vm698_vm1, %v697_v10  ;;  %s820_s6 = scalar_lea.hbm %s867_s5, %s545_s17  ;;  %p638_p13 = pneg %p637_p12 }
  0x18   : > { %v249_v2 = vadd.f32 %v532_v1, %v247_v0  ;;  %v254_v3 = vmul.f32 %v247_v0, %v247_v0  ;;  %v255_v4 = vmul.f32 %v532_v1, %v532_v1  ;;  %v543_v33 = vld [vmem:[%s866_s4] ss:$0 sm:$0xff]  ;;  %s639_s9 = sshll.u32 %s699_s8, 4  ;;  %s640_s9 = int_to_ptr.vmem [resolvable:$false] %s639_s9 }
  0x19   : > { %563 = vmatpush3.bf16.msra.mxu0 %v627_v11  ;;  %575 = vmatpush3.bf16.msra.mxu1 %v628_v12  ;;  %s641_s10 = scalar_lea.vmem %s640_s9, 128  ;;  %p642_p0 = scmp.lt.s32.totalorder %s822_s25, %s640_s9 }
  0x1a   : > { %v251_v5 = vsel %vm250_vm0, %v249_v2, 0.0  ;;  %v256_v6 = vadd.f32 %v255_v4, %v254_v3  ;;  %564 = vmatprep.subr.bf16.mxu0 %v697_v10  ;;  %576 = vmatprep.subr.bf16.mxu1 %v697_v10  ;;  %p643_p1 = scmp.lt.s32.totalorder %s641_s10, %s635_s7 }
  0x1b   : > { %252 = vadd.xlane.f32.xlu0 %v251_v5 }
  0x1c   : > { %v257_v7 = vsel %vm250_vm0, %v256_v6, 0.0  ;;  %p644_p2 = por %p643_p1, %p642_p0 }
  0x1d   : > { %565 = vmatpush3.bf16.msra.mxu0 %v629_v13  ;;  %577 = vmatpush3.bf16.msra.mxu1 %v630_v14 }
  0x1e   : > { %566 = vmatprep.subr.bf16.mxu0 %v697_v10  ;;  %578 = vmatprep.subr.bf16.mxu1 %v697_v10  ;;  %p645_p3 = pnand %p644_p2, %p638_p13 }
  0x1f   : > { %258 = vadd.xlane.f32.xlu0 %v257_v7 }
  0x21   : > { %567 = vmatpush3.bf16.msra.mxu0 %v631_v15  ;;  %579 = vmatpush3.bf16.msra.mxu1 %v632_v16 }
  0xa4   : > { %v253_v17 = vpop.xlane.xlu0 %252 }
  0xa5   : > { %v260_v18 = vmul.f32 0.0078125, %v253_v17 }
  0xa7   : > { %v262_v20 = vmul.f32 %v260_v18, %v260_v18  ;;  %v266_v24 = vsub.f32 %v247_v0, %v260_v18  ;;  %v269_v25 = vsub.f32 %v532_v1, %v260_v18 }
  0xa8   : > { %v259_v19 = vpop.xlane.xlu0 %258 }
  0xa9   : > { %v261_v21 = vmul.f32 0.0078125, %v259_v19 }
  0xab   : > { %v263_v22 = vsub.f32 %v261_v21, %v262_v20 }
  0xad   : > { %v264_v23 = vadd.f32 1e-05, %v263_v22 }
  0xaf   : > { %633 = vrsqrt.f32 %v264_v23 }
  0xbc   : > { %v634_v26 = vpop.eup %633 }
  0xbd   : > { %v270_v27 = vmul.f32 %v634_v26, %v269_v25  ;;  %v267_v28 = vmul.f32 %v634_v26, %v266_v24 }
  0xbf   : > { %v271_v29 = vpack.c.bf16 %v270_v27, %v270_v27  ;;  %v268_v30 = vpack.c.bf16 %v267_v28, %v267_v28 }
  0xc1   : > { %569 = vmatmul.mubr.msk.bf16.vlgmr.msra.gmra.mxu0 %vm312_vm2, %v271_v29  ;;  %581 = vmatmul.mubr.msk.bf16.vlgmr.msra.gmra.mxu1 %vm312_vm2, %v268_v30 }
 0x181   : > { %v350_v31 = vpop.f32.mrf.mxu0  ;;  %v417_v32 = vpop.f32.mrf.mxu1 }
 0x182   : > { %v418_v34 = vadd.f32 %v417_v32, %v350_v31 }
 0x183   : > { %v570_v35 = vpop.f32.mrf.mxu0  ;;  %v582_v36 = vpop.f32.mrf.mxu1 }
 0x184   : > { %v430_v37 = vadd.f32 %v543_v33, %v418_v34 }
 0x185   : > { %v353_v38 = vpop.f32.mrf.mxu0  ;;  %v420_v39 = vpop.f32.mrf.mxu1 }
 0x186   : > { %431 = vst.msk [vmem:[%s234_s23] sm:$0xf] %vm250_vm0, %v430_v37 }
 0x187   : > { %v571_v40 = vpop.f32.mrf.mxu0  ;;  %v583_v41 = vpop.f32.mrf.mxu1 }
 0x188   : > { %648 = shalt.err (!%p645_p3)
}
 0x189   : > { %s649_s11 = scalar_lea.hbm %s820_s6, 64  ;;  %s653_s14 = scalar_lea.hbm %s867_s5, 512 }
 0x18a   : > { %p650_p4 = scmp.ne.s32.totalorder %s820_s6, %s649_s11  ;;  %p654_p9 = scmp.lt.s32.totalorder %s820_s6, %s867_s5 }
 0x18b   : > { %p655_p10 = scmp.lt.s32.totalorder %s653_s14, %s649_s11 }
 0x18c   : > { %p651_p7 = pnand %p650_p4, %p768_p5 }
 0x18d   : > { %p656_p11 = por %p655_p10, %p654_p9 }
 0x18e   : > { %p652_p8 = pneg %p651_p7 }
 0x190   : > { %p657_p12 = pnand %p656_p11, %p652_p8 }
 0x192   : > { %660 = shalt.err (!%p657_p12)
}
 0x193   : > { %584 = dma.vmem_to_hbm [thread:$0]  (%p768_p5), %s822_s25, 64, %s820_s6, %s433_s22  }
 0x194 PF: > { %p590_p13 = scmp.ge.s32.totalorder %s695_s21, 2  ;;  %s458_s17 = sand.u32 1, %s683_s18  }
 0x195   : > { %s459_s23 = scalar_lea.sflag [#allocation3], %s458_s17 }
 0x196   : > { %p587_p0 = pnand %p590_p13, %p772_p6 }
 0x198   : > { %p588_p1 = pneg %p587_p0 }
 0x19a   : > { %678 = dma.done.wait (%p588_p1), %s459_s23, 64  }
 0x19b   : > { %680 = vsyncadd (%p588_p1), %s459_s23, 4294967232  ;;  %p15_p2 = scmp.ge.s32.totalorder %s755_s24, 10   ;;  %s870_s18 = smov %s687_s19 }
 0x19c   : > { %s871_s19 = smov %s691_s20  ;;  %s872_s20 = smov %s766_s27 }
 0x19d   : > { %s873_s21 = smov %s755_s24  ;;  %17 = sbr.rel (!%p15_p2) target bundleno = 3 (0x3), region = 78 }
 0x1a2   :  { %464 = vsyncpa [#allocation3], 1 }
 0x1a3   :  { %466 = vsyncpa [#allocation3 + $0x1], 1 }

</bundles_post_ra>
